<compile_context>
chip_gen: v6e
topology: v6e:2x2x1
jax: 0.10.0
libtpu: 0.0.40
codegen_flags: <defaults>
</compile_context>

<pallas_src>
import functools

import jax
import jax.numpy as jnp
from jax.experimental import pallas as pl
from jax.experimental.pallas import tpu as pltpu


_LANE = 128       # TPU lane width (last dim)
_SUBLANE = 8      # TPU sublane width (second-to-last dim)
_TM_MAX = 256     # rows per M tile (multiple of 8); fits comfortably in VMEM
_TK_MAX = 1024    # K chunk size before we switch to a K-reduction grid


def _round_up(x, m):
    return ((x + m - 1) // m) * m


def _linear_kernel(x_ref, w_ref, b_ref, o_ref, acc_ref):
    """One (TM x TK) @ (TK x Npad) partial product, f32 accumulation.

    Grid is (M tiles, K tiles); K is the innermost reduction axis.  The bias
    add and final cast/store happen once, in the K epilogue.
    """
    k = pl.program_id(1)

    @pl.when(k == 0)
    def _():
        acc_ref[...] = jnp.zeros_like(acc_ref)

    acc_ref[...] += jnp.dot(
        x_ref[...], w_ref[...], preferred_element_type=jnp.float32
    )

    @pl.when(k == pl.num_programs(1) - 1)
    def _():
        o_ref[...] = (acc_ref[...] + b_ref[...]).astype(o_ref.dtype)


def prepare_query_generator_params(weight, bias):
    """Hoist the weight transpose + lane padding out of the forward pass.

    weight: (query_dim, input_dim)   -- PyTorch nn.Linear layout
    bias:   (query_dim,)
    Returns (w_t  [input_dim, Npad], bias2d [1, Npad], query_dim) where
    Npad = round_up(query_dim, 128).
    """
    query_dim, input_dim = weight.shape
    n_pad = _round_up(query_dim, _LANE)
    w_t = weight.T                                   # done once, at load time
    if n_pad != query_dim:
        w_t = jnp.pad(w_t, ((0, 0), (0, n_pad - query_dim)))
        bias = jnp.pad(bias, (0, n_pad - query_dim))
    return w_t, bias.reshape(1, n_pad), query_dim


def query_generator_forward(x, w_t, bias2d, query_dim):
    """y = x @ W^T + b  (torch.nn.Linear semantics).

    x:       (..., input_dim)  float32
    w_t:     (input_dim, Npad) from prepare_query_generator_params
    bias2d:  (1, Npad)
    """
    *lead, input_dim = x.shape
    n_pad = w_t.shape[1]

    m = 1
    for d in lead:
        m *= d
    x2d = x.reshape(m, input_dim)

    # ---- M tiling ------------------------------------------------------
    tm = min(_TM_MAX, _round_up(m, _SUBLANE))
    m_pad = _round_up(m, tm)
    if m_pad != m:
        x2d = jnp.pad(x2d, ((0, m_pad - m), (0, 0)))

    # ---- K tiling (only needed when input_dim is large) ----------------
    if input_dim <= _TK_MAX:
        tk, k_pad = input_dim, input_dim
    else:
        tk = _TK_MAX
        k_pad = _round_up(input_dim, tk)
        x2d = jnp.pad(x2d, ((0, 0), (0, k_pad - input_dim)))
        w_t = jnp.pad(w_t, ((0, k_pad - input_dim), (0, 0)))

    grid_m = m_pad // tm
    grid_k = k_pad // tk

    cost = pl.CostEstimate(
        flops=2 * m * input_dim * query_dim,
        transcendentals=0,
        bytes_accessed=4 * (m * input_dim + input_dim * n_pad + m * n_pad),
    )

    out2d = pl.pallas_call(
        _linear_kernel,
        out_shape=jax.ShapeDtypeStruct((m_pad, n_pad), x.dtype),
        grid_spec=pltpu.PrefetchScalarGridSpec(
            num_scalar_prefetch=0,
            grid=(grid_m, grid_k),
            in_specs=[
                # activations: a new (tm, tk) tile every grid step
                pl.BlockSpec((tm, tk), lambda i, k: (i, k)),
                # weights: block index independent of i -> stays resident in
                # VMEM across the whole M sweep (no re-streaming from HBM)
                pl.BlockSpec((tk, n_pad), lambda i, k: (k, 0)),
                # bias: single lane-dense row, resident
                pl.BlockSpec((1, n_pad), lambda i, k: (0, 0)),
            ],
            out_specs=pl.BlockSpec((tm, n_pad), lambda i, k: (i, 0)),
            scratch_shapes=[pltpu.VMEM((tm, n_pad), jnp.float32)],
        ),
        compiler_params=pltpu.CompilerParams(
            # M tiles are independent -> shard across TensorCores (v7x);
            # K is a reduction -> "arbitrary".
            dimension_semantics=("parallel", "arbitrary"),
        ),
        cost_estimate=cost,
    )(x2d, w_t, bias2d)

    out2d = out2d[:m, :query_dim]
    return out2d.reshape(*lead, query_dim)


if __name__ == "__main__":
    key = jax.random.PRNGKey(0)
    kx, kw, kb, kx2, kw2, kb2 = jax.random.split(key, 6)

    fwd = jax.jit(query_generator_forward, static_argnums=(3,))

    # ---- Test 1: tiny shapes (original harness sizes) -------------------
    batch, seq, input_dim, query_dim = 2, 8, 32, 64
    x = jax.random.normal(kx, (batch, seq, input_dim), dtype=jnp.float32)
    bound = 1.0 / jnp.sqrt(float(input_dim))
    weight = jax.random.uniform(kw, (query_dim, input_dim), jnp.float32, -bound, bound)
    bias = jax.random.uniform(kb, (query_dim,), jnp.float32, -bound, bound)

    w_t, b2d, n_out = prepare_query_generator_params(weight, bias)
    out = jax.block_until_ready(fwd(x, w_t, b2d, n_out))
    ref = (
        jnp.dot(x, weight.T, precision=jax.lax.Precision.HIGHEST) + bias
    )
    assert out.shape == (batch, seq, query_dim)
    assert jnp.allclose(out, ref, atol=1e-4, rtol=1e-4)

    # ---- Test 2: multi-tile path (M padding, multiple M tiles, N padding)
    batch2, seq2, input_dim2, query_dim2 = 2, 160, 96, 80
    x2 = jax.random.normal(kx2, (batch2, seq2, input_dim2), dtype=jnp.float32)
    bound2 = 1.0 / jnp.sqrt(float(input_dim2))
    weight2 = jax.random.uniform(
        kw2, (query_dim2, input_dim2), jnp.float32, -bound2, bound2
    )
    bias2 = jax.random.uniform(kb2, (query_dim2,), jnp.float32, -bound2, bound2)

    w_t2, b2d2, n_out2 = prepare_query_generator_params(weight2, bias2)
    out2 = jax.block_until_ready(fwd(x2, w_t2, b2d2, n_out2))
    ref2 = (
        jnp.dot(x2, weight2.T, precision=jax.lax.Precision.HIGHEST) + bias2
    )
    assert out2.shape == (batch2, seq2, query_dim2)
    assert jnp.allclose(out2, ref2, atol=1e-4, rtol=1e-4)

    print("KERNEL_OK")
</pallas_src>

<mosaic_0001>
module attributes {stable_mosaic.version = 11 : i64} {
  func.func @_linear_kernel(%arg0: i32, %arg1: i32, %arg2: memref<16x32xf32, #tpu.memory_space<vmem>>, %arg3: memref<32x128xf32, #tpu.memory_space<vmem>>, %arg4: memref<1x128xf32, #tpu.memory_space<vmem>>, %arg5: memref<16x128xf32, #tpu.memory_space<vmem>>, %arg6: memref<16x128xf32, #tpu.memory_space<vmem>>) attributes {dimension_semantics = [#tpu.dimension_semantics<parallel>, #tpu.dimension_semantics<arbitrary>], iteration_bounds = array<i64: 1, 1>, scalar_prefetch = 0 : i64, scratch_operands = 1 : i64, tpu.core_type = #tpu.core_type<tc>, window_params = [{transform_indices = @transform_0, window_bounds = array<i64: 16, 32>}, {transform_indices = @transform_1, window_bounds = array<i64: 32, 128>}, {pipeline_mode = #tpu.pipeline_mode<synchronous>, transform_indices = @transform_2, window_bounds = array<i64: 1, 128>}, {transform_indices = @transform_3, window_bounds = array<i64: 16, 128>}]} {
    %c0_i32 = arith.constant 0 : i32
    %0 = arith.cmpi eq, %arg1, %c0_i32 : i32
    %1 = arith.extui %0 : i1 to i32
    %c0_i32_0 = arith.constant 0 : i32
    %2 = arith.cmpi ne, %1, %c0_i32_0 : i32
    scf.if %2 {
      %cst_10 = arith.constant 0.000000e+00 : f32
      %12 = vector.broadcast %cst_10 : f32 to vector<16x128xf32>
      %c0_11 = arith.constant 0 : index
      %c0_12 = arith.constant 0 : index
      %13 = vector.load %arg6[%c0_11, %c0_12] : memref<16x128xf32, #tpu.memory_space<vmem>>, vector<16x128xf32>
      tpu.vector_store %arg6[%c0_11, %c0_12], %12 {strides = array<i32>} : memref<16x128xf32, #tpu.memory_space<vmem>>, vector<16x128xf32>,
    } else {
    }
    %c0 = arith.constant 0 : index
    %c0_1 = arith.constant 0 : index
    %3 = vector.load %arg6[%c0, %c0_1] : memref<16x128xf32, #tpu.memory_space<vmem>>, vector<16x128xf32>
    %c0_2 = arith.constant 0 : index
    %c0_3 = arith.constant 0 : index
    %4 = vector.load %arg2[%c0_2, %c0_3] : memref<16x32xf32, #tpu.memory_space<vmem>>, vector<16x32xf32>
    %c0_4 = arith.constant 0 : index
    %c0_5 = arith.constant 0 : index
    %5 = vector.load %arg3[%c0_4, %c0_5] : memref<32x128xf32, #tpu.memory_space<vmem>>, vector<32x128xf32>
    %cst = arith.constant dense<0.000000e+00> : vector<16x128xf32>
    %6 = tpu.matmul %4, %5, %cst {dimension_numbers = #tpu.dot_dimension_numbers<[1], [0], [0], [1], [0, 0, 1, 1], [], []>} : vector<16x32xf32>, vector<32x128xf32>, vector<16x128xf32> -> vector<16x128xf32>
    %7 = arith.addf %3, %6 : vector<16x128xf32>
    %c0_6 = arith.constant 0 : index
    %c0_7 = arith.constant 0 : index
    %8 = vector.load %arg6[%c0_6, %c0_7] : memref<16x128xf32, #tpu.memory_space<vmem>>, vector<16x128xf32>
    tpu.vector_store %arg6[%c0_6, %c0_7], %7 {strides = array<i32>} : memref<16x128xf32, #tpu.memory_space<vmem>>, vector<16x128xf32>,
    %c0_i32_8 = arith.constant 0 : i32
    %9 = arith.cmpi eq, %arg1, %c0_i32_8 : i32
    %10 = arith.extui %9 : i1 to i32
    %c0_i32_9 = arith.constant 0 : i32
    %11 = arith.cmpi ne, %10, %c0_i32_9 : i32
    scf.if %11 {
      %c0_10 = arith.constant 0 : index
      %c0_11 = arith.constant 0 : index
      %12 = vector.load %arg6[%c0_10, %c0_11] : memref<16x128xf32, #tpu.memory_space<vmem>>, vector<16x128xf32>
      %c0_12 = arith.constant 0 : index
      %c0_13 = arith.constant 0 : index
      %13 = vector.load %arg4[%c0_12, %c0_13] : memref<1x128xf32, #tpu.memory_space<vmem>>, vector<1x128xf32>
      %14 = vector.broadcast %13 : vector<1x128xf32> to vector<16x128xf32>
      %15 = arith.addf %12, %14 : vector<16x128xf32>
      %c0_14 = arith.constant 0 : index
      %c0_15 = arith.constant 0 : index
      %16 = vector.load %arg5[%c0_14, %c0_15] : memref<16x128xf32, #tpu.memory_space<vmem>>, vector<16x128xf32>
      tpu.vector_store %arg5[%c0_14, %c0_15], %15 {strides = array<i32>} : memref<16x128xf32, #tpu.memory_space<vmem>>, vector<16x128xf32>,
    } else {
    }
    return
  }
  func.func @transform_0(%arg0: i32, %arg1: i32) -> (i32, i32) {
    %c0_i32 = arith.constant 0 : i32
    return %arg0, %arg1 : i32, i32
  }
  func.func @transform_1(%arg0: i32, %arg1: i32) -> (i32, i32) {
    %c0_i32 = arith.constant 0 : i32
    %c0_i32_0 = arith.constant 0 : i32
    return %arg1, %c0_i32 : i32, i32
  }
  func.func @transform_2(%arg0: i32, %arg1: i32) -> (i32, i32) {
    %c0_i32 = arith.constant 0 : i32
    %c0_i32_0 = arith.constant 0 : i32
    %c0_i32_1 = arith.constant 0 : i32
    return %c0_i32, %c0_i32_0 : i32, i32
  }
  func.func @transform_3(%arg0: i32, %arg1: i32) -> (i32, i32) {
    %c0_i32 = arith.constant 0 : i32
    %c0_i32_0 = arith.constant 0 : i32
    return %arg0, %c0_i32 : i32, i32
  }
}

</mosaic_0001>

<bundles_post_ra>
// kernel: query_generator_forward.1
= control target key start
LH: loop header
LB: loop body
LE: loop exit
PB: predicated region body
PF: predicated region fallthrough
CT: control target
= control target key end

     0   :  { %8 = vsyncpa [#allocation4], 0  ;;  %s273_s0 = inlined_call_operand.hbm [shape: f32[16,32], index: 0, kind: input, shape index: {}]   ;;  %s274_s1 = inlined_call_operand.hbm [shape: f32[32,128], index: 1, kind: input, shape index: {}]   ;;  %s275_s2 = inlined_call_operand.vmem [shape: f32[1,128], index: 2, kind: input, shape index: {}]   ;;  %s276_s3 = inlined_call_operand.vmem [shape: f32[16,128], index: 3, kind: output, shape index: {}]  }
   0x1   :  { %9 = vsyncpa [#allocation6], 0  ;;  %s232_s12 = smov [#allocation3]  }
   0x2   :  { %s15_s13 = sshll.u32 %s232_s12, 4  ;;  %s16_s13 = int_to_ptr.vmem [resolvable:$true] %s15_s13 }
   0x3   :  { %s196_s14 = scalar_lea.vmem %s16_s13, 256  ;;  %p201_p1 = scmp.lt.s32.totalorder %s16_s13, %s16_s13 }
   0x4   :  { %p197_p0 = scmp.ne.s32.totalorder %s16_s13, %s196_s14  ;;  %p202_p2 = scmp.lt.s32.totalorder %s196_s14, %s196_s14 }
   0x6   :  { %p203_p3 = por %p202_p2, %p201_p1 }
   0x8   :  { %p204_p4 = pnand %p203_p3, %p197_p0 }
   0xa   :  { %207 = shalt.err (!%p204_p4)
}
   0xb   :  { %s233_s15 = smov 128   ;;  %s234_s16 = smov 8  }
   0xc   :  { %21 = dma.hbm_to_vmem [thread:$0]  %s273_s0, 256, %s16_s13, [#allocation4], %s233_s15, %s233_s15, %s234_s16  }
   0xd   :  { %s235_s19 = smov [#allocation5]  }
   0xe   :  { %s27_s20 = sshll.u32 %s235_s19, 4  ;;  %s28_s20 = int_to_ptr.vmem [resolvable:$true] %s27_s20 }
   0xf   :  { %s216_s21 = scalar_lea.vmem %s28_s20, 512  ;;  %p221_p6 = scmp.lt.s32.totalorder %s28_s20, %s28_s20 }
  0x10   :  { %p217_p5 = scmp.ne.s32.totalorder %s28_s20, %s216_s21  ;;  %p222_p7 = scmp.lt.s32.totalorder %s216_s21, %s216_s21 }
  0x12   :  { %p223_p8 = por %p222_p7, %p221_p6 }
  0x14   :  { %p224_p9 = pnand %p223_p8, %p217_p5 }
  0x16   :  { %227 = shalt.err (!%p224_p9)
}
  0x17   :  { %33 = dma.hbm_to_vmem [thread:$0]  %s274_s1, 512, %s28_s20, [#allocation6], %s233_s15, %s233_s15, %s234_s16  }
  0x18   :  { %228 = dma.done.wait [#allocation4], 256  }
  0x19   :  { %229 = vsyncadd [#allocation4], 4294967040 }
  0x1a   :  { %230 = dma.done.wait [#allocation6], 512  }
  0x1b   :  { %231 = vsyncadd [#allocation6], 4294966784  ;;  %vm56_vm0 = vcmask 261120   ;;  %v55_v0 = vld [vmem:[#allocation5 + $0x18] sm:$0xff]  ;;  %v54_v1 = vld [vmem:[#allocation5 + $0x10] sm:$0xff] }
  0x1c   :  { %173 = vmatprep.subr.mxu0 %v55_v0  ;;  %v50_v2 = vld [vmem:[#allocation3] sm:$0xff]  ;;  %v53_v3 = vld [vmem:[#allocation5 + $0x8] sm:$0xff]  ;;  %v52_v4 = vld [vmem:[#allocation5] sm:$0xff] }
  0x1d   :  { %174 = vmatpush3.msra.mxu0 %v55_v0  ;;  %181 = vmatprep.mubr.msk.f32.mxu0 %vm56_vm0, %v50_v2  ;;  %v51_v5 = vld [vmem:[#allocation3 + $0x8] sm:$0xff]  ;;  %v166_v6 = vld [vmem:[%s275_s2] ss:$0 sm:$0xff] }
  0x1e   :  { %175 = vmatprep.subr.mxu0 %v54_v1 }
  0x1f   :  { %176 = vmatpush3.msra.mxu0 %v54_v1 }
  0x20   :  { %177 = vmatprep.subr.mxu0 %v53_v3 }
  0x21   :  { %178 = vmatpush3.msra.mxu0 %v53_v3 }
  0x22   :  { %179 = vmatprep.subr.mxu0 %v52_v4 }
  0x23   :  { %180 = vmatpush3.msra.mxu0 %v52_v4 }
  0x24   :  { %182 = vmatmul.mubr.msk.f32.vlgmr.msra.gmra.mxu0 %vm56_vm0, %v51_v5 }
  0xe4   :  { %v183_v7 = vpop.f32.mrf.mxu0 }
  0xe5   :  { %v155_v8 = vadd.f32 %v183_v7, %v166_v6 }
  0xe6   :  { %v129_v9 = vpop.f32.mrf.mxu0 }
  0xe7   :  { %157 = vst [vmem:[%s276_s3 + $0x8] sm:$0xff] %v155_v8  ;;  %v154_v10 = vadd.f32 %v166_v6, %v129_v9 }
  0xe9   :  { %156 = vst [vmem:[%s276_s3] sm:$0xff] %v154_v10 }
  0xea   :  { %162 = vsyncpa [#allocation4], 1 }
  0xeb   :  { %163 = vsyncpa [#allocation6], 1 }

</bundles_post_ra>
